<compile_context>
chip_gen: v7x
topology: tpu7x:2x2x1
jax: 0.10.0
libtpu: 0.0.40
codegen_flags: <defaults>
</compile_context>

<pallas_src>
import jax
import jax.numpy as jnp
from jax.experimental import pallas as pl
from jax.experimental.pallas import tpu as pltpu

_LANE = 128
_SUBLANE = 8


def _tile_bytes_target():
    """Per-tile byte target.  4 tiles live at once (in + out, each
    double-buffered): 4 x 2 MiB = 8 MiB on v5e (16 MiB default scoped VMEM),
    4 x 4 MiB = 16 MiB on v6e/v7x (32 MiB default scoped VMEM)."""
    try:
        kind = jax.devices()[0].device_kind.lower()
    except Exception:
        kind = ""
    if "v5" in kind:
        return 2 * 1024 * 1024
    return 4 * 1024 * 1024


def _round_up(x, m):
    return -(-x // m) * m


def _pick_row_tile(n_rows, lane_width, itemsize, target_bytes):
    """Rows per block: a multiple of 8 (or the full extent when n_rows <= 8),
    sized so one block carries ~target_bytes of VMEM (lane dim rounded up to
    the 128-lane VMEM padding), and capped at ~ceil(n_rows/2) so the grid has
    at least 2 steps whenever possible (v7x megacore + DMA pipelining)."""
    if n_rows <= _SUBLANE:
        return n_rows  # full-extent block dim is always legal
    row_bytes = max(1, _round_up(lane_width, _LANE) * itemsize)
    t = min(n_rows, max(_SUBLANE, target_bytes // row_bytes))
    t = max(_SUBLANE, (t // _SUBLANE) * _SUBLANE)
    half = max(_SUBLANE, ((n_rows + 1) // 2) // _SUBLANE * _SUBLANE)
    return min(t, half)


def _cost(N, d, itemsize):
    return pl.CostEstimate(
        flops=int(2 * N * d),
        transcendentals=int(N),
        bytes_accessed=int(2 * N * d * itemsize),
    )


# ----------------------------------------------------------------------------
# Packed path (d < 128, d | 128, (128//d) | N): x viewed as (N*d/128, 128).
# arg is computed with one MXU matmul against a block-diagonal weight matrix,
# which also broadcasts the per-row dot back across each group of d lanes.
# ----------------------------------------------------------------------------
def _planar_flow_packed_kernel(x_ref, m_ref, u_ref, b_ref, o_ref):
    zf = x_ref[...].astype(jnp.float32)                     # (TR, 128)
    arg = jnp.dot(zf, m_ref[...],
                  preferred_element_type=jnp.float32) + b_ref[0]   # (TR, 128)
    o_ref[...] = (zf + u_ref[...] * jnp.tanh(arg)).astype(o_ref.dtype)


def _planar_flow_packed(x, w, u, b, k, tile_rows=None):
    N, d = x.shape
    R = N // k
    P = k * d  # == 128
    itemsize = jnp.dtype(x.dtype).itemsize

    xp = x.reshape(R, P)  # contiguous reshape: layout-only, no HBM traffic

    # Block-diagonal M: M[i, j] = w[i % d] if i // d == j // d else 0.
    idx = jnp.arange(P)
    grp = idx // d
    wvec = w.reshape(-1).astype(jnp.float32)[idx % d]                 # (P,)
    m_blockdiag = jnp.where(grp[:, None] == grp[None, :], wvec[:, None], 0.0)
    u_packed = jnp.tile(u.reshape(1, d).astype(jnp.float32), (1, k))  # (1, P)
    b_f32 = b.reshape(1).astype(jnp.float32)

    if tile_rows is None:
        tile_rows = _pick_row_tile(R, P, itemsize, _tile_bytes_target())
    grid = (pl.cdiv(R, tile_rows),)

    out = pl.pallas_call(
        _planar_flow_packed_kernel,
        out_shape=jax.ShapeDtypeStruct((R, P), x.dtype),
        grid_spec=pltpu.PrefetchScalarGridSpec(
            num_scalar_prefetch=0,
            grid=grid,
            in_specs=[
                pl.BlockSpec((tile_rows, P), lambda i: (i, 0)),        # x tile
                pl.BlockSpec((P, P), lambda i: (0, 0)),                # M
                pl.BlockSpec((1, P), lambda i: (0, 0)),                # u packed
                pl.BlockSpec(memory_space=pltpu.MemorySpace.SMEM),     # b
            ],
            out_specs=pl.BlockSpec((tile_rows, P), lambda i: (i, 0)),
        ),
        compiler_params=pltpu.CompilerParams(
            dimension_semantics=("parallel",),
        ),
        cost_estimate=_cost(N, d, itemsize),
    )(xp, m_blockdiag, u_packed, b_f32)
    return out.reshape(N, d)


# ----------------------------------------------------------------------------
# Rows path (d >= 128, or d has no clean 128-packing): natural (TN, d) tiles.
# Reduction stays on VPU+XLU (a 1-lane-wide MXU matmul would be wasted).
# ----------------------------------------------------------------------------
def _planar_flow_rows_kernel(x_ref, w_ref, u_ref, b_ref, o_ref):
    zf = x_ref[...].astype(jnp.float32)                     # (TN, d)
    w = w_ref[...]                                          # (1, d) f32
    u = u_ref[...]                                          # (1, d) f32
    arg = jnp.sum(zf * w, axis=-1, keepdims=True) + b_ref[0]   # (TN, 1)
    o_ref[...] = (zf + u * jnp.tanh(arg)).astype(o_ref.dtype)


def _planar_flow_rows(x, w, u, b, tile_rows=None):
    N, d = x.shape
    itemsize = jnp.dtype(x.dtype).itemsize
    w_f32 = w.reshape(1, d).astype(jnp.float32)
    u_f32 = u.reshape(1, d).astype(jnp.float32)
    b_f32 = b.reshape(1).astype(jnp.float32)

    if tile_rows is None:
        tile_rows = _pick_row_tile(N, d, itemsize, _tile_bytes_target())
    grid = (pl.cdiv(N, tile_rows),)

    return pl.pallas_call(
        _planar_flow_rows_kernel,
        out_shape=jax.ShapeDtypeStruct((N, d), x.dtype),
        grid_spec=pltpu.PrefetchScalarGridSpec(
            num_scalar_prefetch=0,
            grid=grid,
            in_specs=[
                pl.BlockSpec((tile_rows, d), lambda i: (i, 0)),        # x tile
                pl.BlockSpec((1, d), lambda i: (0, 0)),                # w
                pl.BlockSpec((1, d), lambda i: (0, 0)),                # u
                pl.BlockSpec(memory_space=pltpu.MemorySpace.SMEM),     # b
            ],
            out_specs=pl.BlockSpec((tile_rows, d), lambda i: (i, 0)),
        ),
        compiler_params=pltpu.CompilerParams(
            dimension_semantics=("parallel",),
        ),
        cost_estimate=_cost(N, d, itemsize),
    )(x, w_f32, u_f32, b_f32)


# ----------------------------------------------------------------------------
# Public entry point.
# ----------------------------------------------------------------------------
def planar_flow(x, w, u, b, *, tile=None):
    """x: (N, d); w, u: (1, d); b: (1,).  Returns z + u * tanh(z @ w.T + b)."""
    N, d = x.shape
    if d < _LANE and _LANE % d == 0:
        k = _LANE // d
        if N % k == 0:
            return _planar_flow_packed(x, w, u, b, k, tile_rows=tile)
    return _planar_flow_rows(x, w, u, b, tile_rows=tile)


def planar_flow_ref(x, w, u, b):
    arg = x @ w.T + b                   # (N, 1)
    return x + u * jnp.tanh(arg)


if __name__ == "__main__":
    # Deterministic parameter init mirroring the module's __init__
    # (normal with std=init_sigma for u, w; zeros for b).
    init_sigma = 0.01
    key = jax.random.PRNGKey(0)
    keys = jax.random.split(key, 9)

    # Case 1: small latent dim, packed MXU path (d | 128, k=4).
    N1, d1 = 256, 32
    x1 = jax.random.normal(keys[0], (N1, d1), dtype=jnp.float32)
    u1 = init_sigma * jax.random.normal(keys[1], (1, d1), dtype=jnp.float32)
    w1 = init_sigma * jax.random.normal(keys[2], (1, d1), dtype=jnp.float32)
    b1 = jnp.zeros((1,), dtype=jnp.float32)
    out1 = jax.block_until_ready(planar_flow(x1, w1, u1, b1))
    ref1 = planar_flow_ref(x1, w1, u1, b1)
    assert out1.shape == (N1, d1)
    assert jnp.allclose(out1, ref1, atol=1e-5, rtol=1e-5)

    # Case 2: wide latent dim -> rows path.
    N2, d2 = 64, 128
    x2 = jax.random.normal(keys[3], (N2, d2), dtype=jnp.float32)
    u2 = init_sigma * jax.random.normal(keys[4], (1, d2), dtype=jnp.float32)
    w2 = init_sigma * jax.random.normal(keys[5], (1, d2), dtype=jnp.float32)
    b2 = jnp.zeros((1,), dtype=jnp.float32)
    out2 = jax.block_until_ready(planar_flow(x2, w2, u2, b2))
    ref2 = planar_flow_ref(x2, w2, u2, b2)
    assert out2.shape == (N2, d2)
    assert jnp.allclose(out2, ref2, atol=1e-5, rtol=1e-5)

    # Case 3: module default d=3 with awkward N -> rows path, cdiv grid with
    # a masked partial last block.
    N3, d3 = 20, 3
    x3 = jax.random.normal(keys[6], (N3, d3), dtype=jnp.float32)
    u3 = init_sigma * jax.random.normal(keys[7], (1, d3), dtype=jnp.float32)
    w3 = init_sigma * jax.random.normal(keys[8], (1, d3), dtype=jnp.float32)
    b3 = jnp.zeros((1,), dtype=jnp.float32)
    out3 = jax.block_until_ready(planar_flow(x3, w3, u3, b3))
    ref3 = planar_flow_ref(x3, w3, u3, b3)
    assert out3.shape == (N3, d3)
    assert jnp.allclose(out3, ref3, atol=1e-5, rtol=1e-5)

    print("KERNEL_OK")
</pallas_src>

<mosaic_0001>
module attributes {stable_mosaic.version = 11 : i64} {
  func.func @_planar_flow_packed_kernel(%arg0: i32, %arg1: memref<32x128xf32, #tpu.memory_space<vmem>>, %arg2: memref<128x128xf32, #tpu.memory_space<vmem>>, %arg3: memref<1x128xf32, #tpu.memory_space<vmem>>, %arg4: memref<1xf32, #tpu.memory_space<smem>>, %arg5: memref<32x128xf32, #tpu.memory_space<vmem>>) attributes {dimension_semantics = [#tpu.dimension_semantics<parallel>], iteration_bounds = array<i64: 2>, scalar_prefetch = 0 : i64, scratch_operands = 0 : i64, tpu.core_type = #tpu.core_type<tc>, window_params = [{transform_indices = @transform_0, window_bounds = array<i64: 32, 128>}, {pipeline_mode = #tpu.pipeline_mode<synchronous>, transform_indices = @transform_1, window_bounds = array<i64: 128, 128>}, {pipeline_mode = #tpu.pipeline_mode<synchronous>, transform_indices = @transform_2, window_bounds = array<i64: 1, 128>}, {transform_indices = @transform_3, window_bounds = array<i64: 1>}, {transform_indices = @transform_4, window_bounds = array<i64: 32, 128>}]} {
    %c0 = arith.constant 0 : index
    %c0_0 = arith.constant 0 : index
    %0 = vector.load %arg1[%c0, %c0_0] : memref<32x128xf32, #tpu.memory_space<vmem>>, vector<32x128xf32>
    %c0_1 = arith.constant 0 : index
    %c0_2 = arith.constant 0 : index
    %1 = vector.load %arg2[%c0_1, %c0_2] : memref<128x128xf32, #tpu.memory_space<vmem>>, vector<128x128xf32>
    %cst = arith.constant dense<0.000000e+00> : vector<32x128xf32>
    %2 = tpu.matmul %0, %1, %cst {dimension_numbers = #tpu.dot_dimension_numbers<[1], [0], [0], [1], [0, 0, 1, 1], [], []>} : vector<32x128xf32>, vector<128x128xf32>, vector<32x128xf32> -> vector<32x128xf32>
    %c0_3 = arith.constant 0 : index
    %3 = memref.load %arg4[%c0_3] : memref<1xf32, #tpu.memory_space<smem>>
    %4 = vector.broadcast %3 : f32 to vector<32x128xf32>
    %5 = arith.addf %2, %4 : vector<32x128xf32>
    %c0_4 = arith.constant 0 : index
    %c0_5 = arith.constant 0 : index
    %6 = vector.load %arg3[%c0_4, %c0_5] : memref<1x128xf32, #tpu.memory_space<vmem>>, vector<1x128xf32>
    %7 = math.tanh %5 : vector<32x128xf32>
    %8 = vector.broadcast %6 : vector<1x128xf32> to vector<32x128xf32>
    %9 = arith.mulf %8, %7 : vector<32x128xf32>
    %10 = arith.addf %0, %9 : vector<32x128xf32>
    %c0_6 = arith.constant 0 : index
    %c0_7 = arith.constant 0 : index
    %11 = vector.load %arg5[%c0_6, %c0_7] : memref<32x128xf32, #tpu.memory_space<vmem>>, vector<32x128xf32>
    tpu.vector_store %arg5[%c0_6, %c0_7], %10 {strides = array<i32>} : memref<32x128xf32, #tpu.memory_space<vmem>>, vector<32x128xf32>,
    return
  }
  func.func @transform_0(%arg0: i32) -> (i32, i32) {
    %c0_i32 = arith.constant 0 : i32
    %c0_i32_0 = arith.constant 0 : i32
    return %arg0, %c0_i32 : i32, i32
  }
  func.func @transform_1(%arg0: i32) -> (i32, i32) {
    %c0_i32 = arith.constant 0 : i32
    %c0_i32_0 = arith.constant 0 : i32
    %c0_i32_1 = arith.constant 0 : i32
    return %c0_i32, %c0_i32_0 : i32, i32
  }
  func.func @transform_2(%arg0: i32) -> (i32, i32) {
    %c0_i32 = arith.constant 0 : i32
    %c0_i32_0 = arith.constant 0 : i32
    %c0_i32_1 = arith.constant 0 : i32
    return %c0_i32, %c0_i32_0 : i32, i32
  }
  func.func @transform_3(%arg0: i32) -> i32 {
    %c0_i32 = arith.constant 0 : i32
    %c0_i32_0 = arith.constant 0 : i32
    return %c0_i32 : i32
  }
  func.func @transform_4(%arg0: i32) -> (i32, i32) {
    %c0_i32 = arith.constant 0 : i32
    %c0_i32_0 = arith.constant 0 : i32
    return %arg0, %c0_i32 : i32, i32
  }
}

</mosaic_0001>

<bundles_post_ra>
// kernel: tpu_custom_call.1
= control target key start
LH: loop header
LB: loop body
LE: loop exit
PB: predicated region body
PF: predicated region fallthrough
CT: control target
= control target key end

     0   :  { %s1048_s0 = inlined_call_operand.hbm [shape: f32[64,128], index: 0, kind: input, shape index: {}]   ;;  %s1049_s1 = inlined_call_operand.hbm [shape: f32[128,128], index: 1, kind: input, shape index: {}]   ;;  %s1050_s2 = inlined_call_operand.vmem [shape: f32[1,128], index: 2, kind: input, shape index: {}]   ;;  %s1051_s3 = inlined_call_operand.<no memory space> [shape: f32[1], index: 3, kind: input, shape index: {}]   ;;  %s1052_s4 = inlined_call_operand.hbm [shape: f32[64,128], index: 4, kind: output, shape index: {}]  }
   0x1   :  { %9 = sst [smem:[#allocation2]] %s1051_s3 }
   0x2   :  { %10 = vsyncpa [#allocation4], 0 }
   0x3   :  { %12 = vsyncpa [#allocation4 + $0x1], 0 }
   0x4   :  { %13 = vsyncpa [#allocation7], 0 }
   0x5   :  { %14 = vsyncpa [#allocation5], 0 }
   0x6   :  { %16 = vsyncpa [#allocation5 + $0x1], 0  ;;  %s820_s17 = smov 0   ;;  %s822_s18 = smov 0  }
   0x7   :  { %s824_s19 = smov 0   ;;  %s826_s20 = smov 0  }
   0x8 LB: > { %s841_s3 = sadd.s32 4294967295, %s783_s20   ;;  %s461_s21 = sadd.s32 4294967294, %s783_s20   ;;  %s783_s20 = sphi %s826_s20, %s1072_s20   ;;  %s779_s19 = sphi %s824_s19, %s1071_s19   ;;  %s775_s18 = sphi %s822_s18, %s1070_s18   ;;  %s771_s17 = sphi %s820_s17, %s1069_s17  }
   0x9   : > { %p42_p0 = scmp.ne.s32.totalorder %s775_s18, %s771_s17  ;;  %p1053_p1 = scmp.eq.s32.totalorder %s841_s3, 0 }
   0xa   : > { %p135_p3 = scmp.eq.s32.totalorder %s461_s21, 1  ;;  %p462_p5 = scmp.ge.s32.totalorder %s783_s20, 1 }
   0xb   : > { %p850_p4 = por %p1053_p1, %p42_p0  ;;  %p142_p7 = scmp.lt.s32.totalorder %s783_s20, 3 }
   0xc   : > { %p855_p6 = por %p135_p3, %p42_p0  ;;  %s785_s25 = smov [#allocation6]  }
   0xd   : > { %s1056_s22 = scalar_select %p850_p4, 1, 0 }
   0xe   : > { %s1057_s23 = scalar_select %p855_p6, 1, 0 }
   0xf   : > { %p860_p8 = pnand %p462_p5, %p142_p7  ;;  %s154_s26 = sshll.u32 %s785_s25, 4  ;;  %s864_s26 = int_to_ptr.vmem [resolvable:$true] %s154_s26 }
  0x10   : > { %s876_s28 = sadd.s32 1, %s783_s20   ;;  %s29_s29 = sadd.s32 1, %s779_s19 }
  0x11   : > { %s1058_s24 = scalar_select %p860_p8, 1, 0 }
  0x12   : > { %p594_p9 = pneg %p860_p8  ;;  %s26_s30 = ssub.s32 %s783_s20, %s876_s28 }
  0x13   : > { %s655_s7 = scalar_lea.hbm %s1049_s1, 2048 }
  0x14   : > { %p871_p11 = pnand %p594_p9, %p1053_p1  ;;  %p656_p12 = scmp.ne.s32.totalorder %s1049_s1, %s655_s7 }
  0x15   : > { %p662_p5 = scmp.lt.u32.totalorder %s655_s7, %s1049_s1 }
  0x16   : > { %p657_p13 = pneg %p871_p11 }
  0x18   : > { %p658_p0 = pnand %p657_p13, %p656_p12 }
  0x1a   : > { %p659_p3 = pneg %p658_p0 }
  0x1c   : > { %p664_p7 = pnand %p662_p5, %p659_p3 }
  0x1e   : > { %667 = shalt.err (!%p664_p7)
}
  0x1f   : > { %s668_s12 = scalar_lea.vmem %s864_s26, 2048  ;;  %p676_p2 = scmp.lt.s32.totalorder %s864_s26, %s864_s26 }
  0x20   : > { %p669_p9 = scmp.ne.s32.totalorder %s864_s26, %s668_s12  ;;  %p677_p6 = scmp.lt.s32.totalorder %s668_s12, %s668_s12 }
  0x22   : > { %p671_p10 = pnand %p669_p9, %p657_p13  ;;  %p678_p4 = por %p677_p6, %p676_p2 }
  0x24   : > { %p672_p1 = pneg %p671_p10 }
  0x26   : > { %p679_p8 = pnand %p678_p4, %p672_p1 }
  0x28   : > { %682 = shalt.err (!%p679_p8)
}
  0x29   : > { %s786_s13 = smov 128   ;;  %s787_s14 = smov 8  }
  0x2a   : > { %597 = dma.hbm_to_vmem [thread:$0]  (!%p871_p11), %s1049_s1, 2048, %s864_s26, [#allocation7], %s786_s13, %s786_s13, %s787_s14  }
  0x2b   : > { %p27_p1 = scmp.eq.s32.totalorder %s26_s30, 0  ;;  %p36_p2 = scmp.ne.s32.totalorder %s779_s19, %s775_s18 }
  0x2c   : > { %p37_p4 = scmp.eq.s32.totalorder %s783_s20, 0  ;;  %p607_p6 = scmp.lt.s32.totalorder %s783_s20, 2 }
  0x2d   : > { %s910_s21 = scalar_select %p27_p1, %s779_s19, %s29_s29  }
  0x2e   : > { %p38_p8 = por %p37_p4, %p36_p2  ;;  %p1060_p10 = scmp.eq.s32.totalorder %s841_s3, 1 }
  0x2f   : > { %s174_s27 = sand.u32 1, %s779_s19   ;;  %s478_s5 = sshll.u32 %s783_s20, 9 }
  0x30   : > { %p914_p12 = por %p1060_p10, %p36_p2  ;;  %s465_s6 = sshll.u32 %s174_s27, 5 }
  0x31   : > { %s923_s9 = scalar_lea.hbm %s1048_s0, %s478_s5  ;;  %s178_s26 = scalar_lea.vmem [#allocation3], %s465_s6 }
  0x32   : > { %s185_s29 = sshll.u32 %s178_s26, 4  ;;  %p925_p11 = pnand %p607_p6, %p38_p8  ;;  %s929_s29 = int_to_ptr.vmem [resolvable:$true] %s185_s29 }
  0x33   : > { %s931_s10 = scalar_lea.sflag [#allocation4], %s174_s27  ;;  %s683_s11 = scalar_lea.hbm %s923_s9, 512 }
  0x34   : > { %p684_p13 = scmp.ne.s32.totalorder %s923_s9, %s683_s11  ;;  %p685_p0 = pneg %p925_p11 }
  0x35   : > { %s688_s16 = scalar_lea.hbm %s1048_s0, 1024  ;;  %p689_p7 = scmp.lt.u32.totalorder %s923_s9, %s1048_s0 }
  0x36   : > { %p686_p3 = pnand %p685_p0, %p684_p13  ;;  %p690_p9 = scmp.lt.u32.totalorder %s688_s16, %s683_s11 }
  0x37   : > { %p692_p2 = scmp.lt.u32.totalorder %s683_s11, %s923_s9 }
  0x38   : > { %p687_p5 = pneg %p686_p3  ;;  %p691_p1 = por %p690_p9, %p689_p7 }
  0x3a   : > { %p693_p4 = por %p692_p2, %p691_p1 }
  0x3c   : > { %p694_p6 = pnand %p693_p4, %p687_p5 }
  0x3e   : > { %697 = shalt.err (!%p694_p6)
}
  0x3f   : > { %s698_s27 = scalar_lea.vmem %s929_s29, 512  ;;  %s788_s7 = smov [#allocation3]  }
  0x40   : > { %p699_p8 = scmp.ne.s32.totalorder %s929_s29, %s698_s27  ;;  %s703_s8 = sshll.u32 %s788_s7, 4  ;;  %s704_s8 = int_to_ptr.vmem [resolvable:$false] %s703_s8 }
  0x41   : > { %s705_s26 = scalar_lea.vmem %s704_s8, 1024  ;;  %p706_p3 = scmp.lt.s32.totalorder %s929_s29, %s704_s8 }
  0x42   : > { %p701_p10 = pnand %p699_p8, %p685_p0  ;;  %p707_p7 = scmp.lt.s32.totalorder %s705_s26, %s698_s27 }
  0x44   : > { %p702_p13 = pneg %p701_p10  ;;  %p708_p9 = por %p707_p7, %p706_p3 }
  0x46   : > { %p709_p1 = pnand %p708_p9, %p702_p13 }
  0x48   : > { %712 = shalt.err (!%p709_p1)
}
  0x49   : > { %601 = dma.hbm_to_vmem [thread:$0]  (!%p925_p11), %s923_s9, 512, %s929_s29, %s931_s10, %s786_s13, %s786_s13, %s787_s14  }
  0x4a   : > { %p1063_p0 = scmp.ne.s32.totalorder %s1058_s24, 0 }
  0x4b   : > { %s965_s11 = sand.u32 (!%p1063_p0), 1, %s775_s18   ;;  %p1064_p5 = scmp.ne.s32.totalorder (!%p1063_p0), %s1056_s22, 0 }
  0x4c   : > { %197 = sbr.rel (%p1063_p0) target bundleno = 369 (0x171), region = 36  ;;  %s469_s12 = sshll.u32 (!%p1063_p0), %s965_s11, 5 }
  0x4d   : > { %s200_s15 = scalar_lea.sflag (!%p1063_p0), [#allocation4], %s965_s11  ;;  %s971_s30 = scalar_lea.vmem (!%p1063_p0), [#allocation3], %s469_s12 }
  0x53   : > { %758 = dma.done.wait (%p1064_p5), %s200_s15, 512  }
  0x54   : > { %760 = vsyncadd (%p1064_p5), %s200_s15, 4294966784  ;;  %p1065_p11 = scmp.eq.s32.totalorder %s841_s3, 0 }
  0x56   : > { %762 = dma.done.wait (%p1065_p11), [#allocation7], 2048   ;;  %p1066_p2 = pmov %p1065_p11 }
  0x57   : > { %v238_v0 = vld [vmem:[#allocation6] sm:$0xff]  ;;  %v239_v1 = vld [vmem:[#allocation6 + $0x8] sm:$0xff]  ;;  %v240_v2 = vld [vmem:[#allocation6 + $0x10] sm:$0xff]  ;;  %s254_s22 = sld [smem:[#allocation2]]  ;;  %s479_s14 = sshll.u32 %s841_s3, 9 }
  0x58   : > { %764 = vsyncadd (%p1066_p2), [#allocation7], 4294965248  ;;  %v538_v3 = vpack.c.bf16 %v239_v1, %v238_v0  ;;  %v241_v4 = vld [vmem:[#allocation6 + $0x18] sm:$0xff]  ;;  %v242_v6 = vld [vmem:[#allocation6 + $0x20] sm:$0xff]  ;;  %s231_s9 = scalar_lea.vmem [#allocation8], %s469_s12  ;;  %s1001_s5 = scalar_lea.hbm %s1052_s4, %s479_s14 }
  0x59   : > { %v542_v5 = vpack.c.bf16 %v241_v4, %v240_v2  ;;  %v243_v7 = vld [vmem:[#allocation6 + $0x28] sm:$0xff]  ;;  %v982_v9 = vld [vmem:[%s971_s30] sm:$0xff]  ;;  %v985_v10 = vld [vmem:[%s971_s30 + $0x10] sm:$0xff]  ;;  %s378_s29 = sshll.u32 %s231_s9, 4  ;;  %s365_s3 = scalar_lea.sflag [#allocation5], %s965_s11  ;;  %s1003_s29 = int_to_ptr.vmem [resolvable:$true] %s378_s29 }
  0x5a   : > { %539 = vmatprep.subr.bf16.mxu0 %v538_v3  ;;  %570 = vmatprep.subr.bf16.mxu1 %v538_v3  ;;  %v546_v8 = vpack.c.bf16 %v243_v7, %v242_v6  ;;  %v244_v11 = vld [vmem:[#allocation6 + $0x30] sm:$0xff]  ;;  %v245_v12 = vld [vmem:[#allocation6 + $0x38] sm:$0xff]  ;;  %v246_v14 = vld [vmem:[#allocation6 + $0x40] sm:$0xff]  ;;  %s713_s6 = scalar_lea.vmem %s1003_s29, 512  ;;  %s789_s27 = smov [#allocation8]  }
  0x5b   : > { %541 = vmatpush3.bf16.msra.mxu0 %v538_v3  ;;  %578 = vmatpush3.bf16.msra.mxu1 %v538_v3  ;;  %v550_v13 = vpack.c.bf16 %v245_v12, %v244_v11  ;;  %v247_v15 = vld [vmem:[#allocation6 + $0x48] sm:$0xff]  ;;  %v248_v17 = vld [vmem:[#allocation6 + $0x50] sm:$0xff]  ;;  %v249_v18 = vld [vmem:[#allocation6 + $0x58] sm:$0xff]  ;;  %p714_p4 = scmp.ne.s32.totalorder %s1003_s29, %s713_s6  ;;  %s717_s7 = sshll.u32 %s789_s27, 4  ;;  %s718_s7 = int_to_ptr.vmem [resolvable:$false] %s717_s7 }
  0x5c   : > { %543 = vmatprep.subr.bf16.mxu0 %v542_v5  ;;  %571 = vmatprep.subr.bf16.mxu1 %v542_v5  ;;  %v554_v16 = vpack.c.bf16 %v247_v15, %v246_v14  ;;  %v558_v19 = vpack.c.bf16 %v249_v18, %v248_v17  ;;  %v250_v20 = vld [vmem:[#allocation6 + $0x60] sm:$0xff]  ;;  %v251_v21 = vld [vmem:[#allocation6 + $0x68] sm:$0xff]  ;;  %v252_v23 = vld [vmem:[#allocation6 + $0x70] sm:$0xff]  ;;  %s719_s8 = scalar_lea.vmem %s718_s7, 1024  ;;  %p720_p10 = scmp.lt.s32.totalorder %s1003_s29, %s718_s7 }
  0x5d   : > { %532 = vmatprep.mubr.f32.mxu0 %v982_v9  ;;  %535 = vmatprep.mubr.f32.mxu1 %v985_v10  ;;  %v562_v22 = vpack.c.bf16 %v251_v21, %v250_v20  ;;  %v253_v24 = vld [vmem:[#allocation6 + $0x78] sm:$0xff]  ;;  %v235_v26 = vld [vmem:[%s971_s30 + $0x8] sm:$0xff]  ;;  %v255_v28 = vstv %s254_s22  ;;  %v472_v37 = vld [vmem:[%s1050_s2] ss:$0 sm:$0xff]  ;;  %p715_p6 = pnand %p714_p4, %p914_p12  ;;  %p721_p13 = scmp.lt.s32.totalorder %s719_s8, %s713_s6 }
  0x5e   : > { %v566_v25 = vpack.c.bf16 %v253_v24, %v252_v23  ;;  %v237_v27 = vld [vmem:[%s971_s30 + $0x18] sm:$0xff] }
  0x5f   : > { %545 = vmatpush3.bf16.msra.mxu0 %v542_v5  ;;  %579 = vmatpush3.bf16.msra.mxu1 %v542_v5  ;;  %p716_p8 = pneg %p715_p6  ;;  %p722_p3 = por %p721_p13, %p720_p10 }
  0x60   : > { %547 = vmatprep.subr.bf16.mxu0 %v546_v8  ;;  %572 = vmatprep.subr.bf16.mxu1 %v546_v8 }
  0x61   : > { %p723_p7 = pnand %p722_p3, %p716_p8 }
  0x63   : > { %549 = vmatpush3.bf16.msra.mxu0 %v546_v8  ;;  %580 = vmatpush3.bf16.msra.mxu1 %v546_v8 }
  0x64   : > { %551 = vmatprep.subr.bf16.mxu0 %v550_v13  ;;  %573 = vmatprep.subr.bf16.mxu1 %v550_v13 }
  0x67   : > { %553 = vmatpush3.bf16.msra.mxu0 %v550_v13  ;;  %581 = vmatpush3.bf16.msra.mxu1 %v550_v13 }
  0x68   : > { %555 = vmatprep.subr.bf16.mxu0 %v554_v16  ;;  %574 = vmatprep.subr.bf16.mxu1 %v554_v16 }
  0x6b   : > { %557 = vmatpush3.bf16.msra.mxu0 %v554_v16  ;;  %582 = vmatpush3.bf16.msra.mxu1 %v554_v16 }
  0x6c   : > { %559 = vmatprep.subr.bf16.mxu0 %v558_v19  ;;  %575 = vmatprep.subr.bf16.mxu1 %v558_v19 }
  0x6f   : > { %561 = vmatpush3.bf16.msra.mxu0 %v558_v19  ;;  %583 = vmatpush3.bf16.msra.mxu1 %v558_v19 }
  0x70   : > { %563 = vmatprep.subr.bf16.mxu0 %v562_v22  ;;  %576 = vmatprep.subr.bf16.mxu1 %v562_v22 }
  0x73   : > { %565 = vmatpush3.bf16.msra.mxu0 %v562_v22  ;;  %584 = vmatpush3.bf16.msra.mxu1 %v562_v22 }
  0x74   : > { %567 = vmatprep.subr.bf16.mxu0 %v566_v25  ;;  %577 = vmatprep.subr.bf16.mxu1 %v566_v25 }
  0x77   : > { %569 = vmatpush3.bf16.msra.mxu0 %v566_v25  ;;  %585 = vmatpush3.bf16.msra.mxu1 %v566_v25 }
  0x7a   : > { %533 = vmatmul.mubr.f32.vlgmr.msra.gmra.mrb[0].mxu0 %v235_v26  ;;  %536 = vmatmul.mubr.f32.vlgmr.msra.gmra.mrb[0].mxu1 %v237_v27 }
 0x14d   : > { %v534_v29 = vpop.f32.mrb[0].mxu0  ;;  %v537_v30 = vpop.f32.mrb[0].mxu1 }
 0x14e   : > { %v328_v31 = vadd.f32 %v534_v29, %v255_v28  ;;  %v338_v32 = vadd.f32 %v537_v30, %v255_v28  ;;  %v322_v33 = vpop.f32.mrb[1].mxu0  ;;  %v332_v34 = vpop.f32.mrb[1].mxu1 }
 0x14f   : > { %v323_v35 = vadd.f32 %v322_v33, %v255_v28  ;;  %v333_v36 = vadd.f32 %v332_v34, %v255_v28 }
 0x150   : > { %647 = vtanh.f32 %v328_v31 }
 0x151   : > { %649 = vtanh.f32 %v338_v32 }
 0x152   : > { %651 = vtanh.f32 %v323_v35 }
 0x153   : > { %653 = vtanh.f32 %v333_v36 }
 0x15a   : > { %v648_v38 = vpop.eup %647 }
 0x15b   : > { %v650_v39 = vpop.eup %649  ;;  %v353_v40 = vmul.f32 %v648_v38, %v472_v37 }
 0x15c   : > { %v652_v41 = vpop.eup %651  ;;  %v355_v42 = vmul.f32 %v650_v39, %v472_v37 }
 0x15d   : > { %v654_v43 = vpop.eup %653  ;;  %v357_v44 = vadd.f32 %v353_v40, %v235_v26  ;;  %v352_v45 = vmul.f32 %v652_v41, %v472_v37 }
 0x15e   : > { %v359_v46 = vadd.f32 %v355_v42, %v237_v27  ;;  %v354_v47 = vmul.f32 %v654_v43, %v472_v37 }
 0x15f   : > { %361 = vst [vmem:[%s231_s9 + $0x8] sm:$0xff] %v357_v44  ;;  %v356_v48 = vadd.f32 %v352_v45, %v982_v9 }
 0x160   : > { %363 = vst [vmem:[%s231_s9 + $0x18] sm:$0xff] %v359_v46  ;;  %v358_v49 = vadd.f32 %v354_v47, %v985_v10 }
 0x161   : > { %360 = vst [vmem:[%s231_s9] sm:$0xff] %v356_v48 }
 0x162   : > { %362 = vst [vmem:[%s231_s9 + $0x10] sm:$0xff] %v358_v49 }
 0x163   : > { %726 = shalt.err (!%p723_p7)
}
 0x164   : > { %s727_s26 = scalar_lea.hbm %s1001_s5, 512  ;;  %s731_s30 = scalar_lea.hbm %s1052_s4, 1024 }
 0x165   : > { %p728_p9 = scmp.ne.s32.totalorder %s1001_s5, %s727_s26  ;;  %p732_p5 = scmp.lt.u32.totalorder %s1001_s5, %s1052_s4 }
 0x166   : > { %p733_p11 = scmp.lt.u32.totalorder %s731_s30, %s727_s26  ;;  %p735_p4 = scmp.lt.u32.totalorder %s727_s26, %s1001_s5 }
 0x167   : > { %p729_p1 = pnand %p728_p9, %p914_p12 }
 0x168   : > { %p734_p2 = por %p733_p11, %p732_p5 }
 0x169   : > { %p730_p0 = pneg %p729_p1 }
 0x16a   : > { %p736_p6 = por %p735_p4, %p734_p2 }
 0x16c   : > { %p737_p8 = pnand %p736_p6, %p730_p0 }
 0x16e   : > { %740 = shalt.err (!%p737_p8)
}
 0x16f   : > { %s790_s13 = smov 128   ;;  %s791_s14 = smov 8  }
 0x170   : > { %592 = dma.vmem_to_hbm [thread:$0]  (%p914_p12), %s1003_s29, 512, %s1001_s5, %s365_s3, %s790_s13, %s790_s13, %s791_s14  }
 0x171 PF: > { %s393_s9 = sand.u32 1, %s771_s17   ;;  %p1067_p10 = scmp.ne.s32.totalorder %s1057_s23, 0 }
 0x172   : > { %p1068_p13 = scmp.ge.s32.totalorder %s783_s20, 2  ;;  %s394_s10 = scalar_lea.sflag [#allocation5], %s393_s9 }
 0x174   : > { %p603_p3 = pnand %p1068_p13, %p1067_p10 }
 0x176   : > { %766 = dma.done.wait (!%p603_p3), %s394_s10, 512  }
 0x177   : > { %768 = vsyncadd (!%p603_p3), %s394_s10, 4294966784  ;;  %p19_p7 = scmp.ge.s32.totalorder %s876_s28, 4   ;;  %s1069_s17 = smov %s775_s18 }
 0x178   : > { %s1070_s18 = smov %s779_s19  ;;  %s1071_s19 = smov %s910_s21 }
 0x179   : > { %s1072_s20 = smov %s876_s28  ;;  %21 = sbr.rel (!%p19_p7) target bundleno = 8 (0x8), region = 85 }
 0x180   :  { %399 = vsyncpa [#allocation4], 1 }
 0x181   :  { %401 = vsyncpa [#allocation4 + $0x1], 1 }
 0x182   :  { %402 = vsyncpa [#allocation7], 1 }
 0x183   :  { %403 = vsyncpa [#allocation5], 1 }
 0x184   :  { %405 = vsyncpa [#allocation5 + $0x1], 1 }

</bundles_post_ra>
